<compile_context>
chip_gen: v5e
topology: v5e:2x2
jax: 0.10.0
libtpu: 0.0.40
codegen_flags: <defaults>
</compile_context>

<pallas_src>
import functools

import jax
import jax.numpy as jnp
from jax.experimental import pallas as pl
from jax.experimental.pallas import tpu as pltpu


def _pick_tiles(b, c, hw, itemsize, target_bytes):
    """Choose (batch_tile, hw_tile) so each (Bb, C, T_HW) x block is ~target_bytes.

    Large feature maps: tile the spatial axis (multiple of 128), one image per
    step.  Small feature maps: keep the full spatial extent and tile the batch
    axis instead, so per-step DMAs are multi-MiB instead of overhead-bound.
    """
    col_bytes = c * itemsize                 # bytes of one (C,) spatial column
    slab_bytes = col_bytes * hw              # one full (1, C, HW) image slab

    if slab_bytes >= target_bytes:
        t_hw = max(128, (target_bytes // col_bytes) // 128 * 128)
        if t_hw >= hw:
            t_hw = hw
        return 1, t_hw

    # Batch-tile: largest divisor of B with bb * slab <= target.
    want = max(1, target_bytes // slab_bytes)
    divisors = [d for d in range(b, 0, -1) if b % d == 0]
    bb = next(d for d in divisors if d <= want)
    # Keep >=2 blocks on the (parallel) batch axis for dual-TensorCore parts
    # (v7x) when each block is still >= 1 MiB; neutral on v5e/v6e.
    if bb == b and b >= 2:
        proper = next(d for d in divisors if d < b)
        if proper * slab_bytes >= (1 << 20):
            bb = proper
    return bb, hw


def _channel_attention_kernel(x_ref, w1t_ref, w2t_ref, o_ref, max_acc, sum_acc,
                              *, hw_total, t_hw, needs_mask):
    # x_ref   : (Bb, C, T_HW)  batch block x spatial tile, native dtype
    # w1t_ref : (C, Cr)        transpose of Conv2d(C, Cr, 1) weight
    # w2t_ref : (Cr, C)        transpose of Conv2d(Cr, C, 1) weight
    # o_ref   : (Bb, C)
    # max_acc : (Bb, C) f32 running max;  sum_acc : (Bb, C) f32 running sum
    hw_idx = pl.program_id(1)
    last = pl.num_programs(1) - 1

    @pl.when(hw_idx == 0)
    def _init():
        max_acc[...] = jnp.full_like(max_acc, -jnp.inf)
        sum_acc[...] = jnp.zeros_like(sum_acc)

    x = x_ref[...]                                   # (Bb, C, T_HW), native

    def accumulate(x_for_max, x_for_sum):
        tile_max = jnp.max(x_for_max, axis=-1)                       # (Bb, C)
        tile_sum = jnp.sum(x_for_sum, axis=-1, dtype=jnp.float32)    # (Bb, C)
        max_acc[...] = jnp.maximum(max_acc[...], tile_max.astype(jnp.float32))
        sum_acc[...] = sum_acc[...] + tile_sum

    if needs_mask:
        # Steady-state steps: minimal max + add per element, no mask cost.
        @pl.when(hw_idx != last)
        def _steady():
            accumulate(x, x)

        # Only the (single) partial last tile pays the mask.
        @pl.when(hw_idx == last)
        def _masked():
            lane = jax.lax.broadcasted_iota(jnp.int32, (1, 1, t_hw), 2)
            valid = (hw_idx * t_hw + lane) < hw_total
            if jnp.issubdtype(x.dtype, jnp.floating):
                lowest = jnp.array(jnp.finfo(x.dtype).min, dtype=x.dtype)
            else:
                lowest = jnp.array(jnp.iinfo(x.dtype).min, dtype=x.dtype)
            accumulate(jnp.where(valid, x, lowest),
                       jnp.where(valid, x, jnp.zeros((), x.dtype)))
    else:
        accumulate(x, x)

    @pl.when(hw_idx == last)
    def _finalize():
        inv_hw = jnp.float32(1.0 / hw_total)
        max_p = max_acc[...]                          # (Bb, C) f32
        avg_p = sum_acc[...] * inv_hw                 # fold 1/HW into the read
        w1t = w1t_ref[...].astype(jnp.float32)        # (C, Cr)
        w2t = w2t_ref[...].astype(jnp.float32)        # (Cr, C)

        def se(p):
            mid = jnp.maximum(
                jnp.dot(p, w1t, preferred_element_type=jnp.float32), 0.0)
            return jnp.dot(mid, w2t, preferred_element_type=jnp.float32)

        out = jax.nn.sigmoid(se(max_p) + se(avg_p))   # (Bb, C)
        o_ref[...] = out.astype(o_ref.dtype)


def channel_attention(x, w1, w2, *, hw_tile=None, batch_tile=None,
                      target_block_bytes=8 * 1024 * 1024):
    """x: (B, C, H, W) NCHW; w1: (Cr, C, 1, 1); w2: (C, Cr, 1, 1).
    Returns (B, C, 1, 1), matching the PyTorch module."""
    B, C, H, W = x.shape
    Cr = w1.shape[0]
    assert w1.shape == (Cr, C, 1, 1) and w2.shape == (C, Cr, 1, 1)
    HW = H * W

    x_flat = x.reshape(B, C, HW)
    w1t = jnp.transpose(w1[:, :, 0, 0], (1, 0))       # (C, Cr)
    w2t = jnp.transpose(w2[:, :, 0, 0], (1, 0))       # (Cr, C)

    if hw_tile is None and batch_tile is None:
        bb, t_hw = _pick_tiles(B, C, HW, x.dtype.itemsize, target_block_bytes)
    else:
        t_hw = HW if hw_tile is None else min(int(hw_tile), HW)   # clamp to HW
        assert t_hw == HW or t_hw % 128 == 0, \
            "hw_tile must cover HW or be a multiple of 128"
        bb = 1 if batch_tile is None else int(batch_tile)
        assert bb >= 1 and B % bb == 0, "batch_tile must divide B"

    n_hw = pl.cdiv(HW, t_hw)
    needs_mask = (HW % t_hw) != 0

    # 2-deep buffered x tiles plus weights/scratch/output stay under 32 MiB for
    # all normal shapes; the max() only grows the limit in extreme-C corner
    # cases where the minimum 128-lane tile is already large.
    block_bytes = bb * C * t_hw * x.dtype.itemsize
    vmem_limit = max(32 * 1024 * 1024, 2 * block_bytes + (4 << 20))

    kernel = functools.partial(
        _channel_attention_kernel,
        hw_total=HW, t_hw=t_hw, needs_mask=needs_mask)

    out_flat = pl.pallas_call(
        kernel,
        out_shape=jax.ShapeDtypeStruct((B, C), x.dtype),
        grid_spec=pltpu.PrefetchScalarGridSpec(
            num_scalar_prefetch=0,
            grid=(B // bb, n_hw),
            in_specs=[
                pl.BlockSpec((bb, C, t_hw), lambda b, h: (b, 0, h)),
                pl.BlockSpec((C, Cr), lambda b, h: (0, 0)),
                pl.BlockSpec((Cr, C), lambda b, h: (0, 0)),
            ],
            out_specs=pl.BlockSpec((bb, C), lambda b, h: (b, 0)),
            scratch_shapes=[
                pltpu.VMEM((bb, C), jnp.float32),     # running max
                pltpu.VMEM((bb, C), jnp.float32),     # running sum
            ],
        ),
        compiler_params=pltpu.CompilerParams(
            dimension_semantics=("parallel", "arbitrary"),
            vmem_limit_bytes=vmem_limit,
        ),
    )(x_flat, w1t, w2t)

    return out_flat.reshape(B, C, 1, 1)


def _reference(x, w1, w2):
    """Pure-JAX reference mirroring the PyTorch forward."""
    max_p = jnp.max(x, axis=(2, 3))                       # (B, C)
    avg_p = jnp.mean(x, axis=(2, 3))                      # (B, C)
    w1m = w1[:, :, 0, 0]                                  # (Cr, C)
    w2m = w2[:, :, 0, 0]                                  # (C, Cr)

    def se(p):
        mid = jnp.maximum(p @ w1m.T, 0.0)                 # (B, Cr)
        return mid @ w2m.T                                # (B, C)

    out = jax.nn.sigmoid(se(max_p) + se(avg_p))
    return out[:, :, None, None]


if __name__ == "__main__":
    # Small shapes consistent with the module: channel=64, reduction=16.
    B, C, H, W = 2, 64, 16, 16
    reduction = 16
    Cr = C // reduction

    key = jax.random.PRNGKey(0)
    kx, k1, k2, kx2 = jax.random.split(key, 4)

    x = jax.random.normal(kx, (B, C, H, W), dtype=jnp.float32)
    # Deterministic synthetic weights (Conv2d kernel_size=1, bias=False shapes).
    w1 = jax.random.normal(k1, (Cr, C, 1, 1), dtype=jnp.float32) * 0.1
    w2 = jax.random.normal(k2, (C, Cr, 1, 1), dtype=jnp.float32) * 0.1

    # 1) Default auto-tiled path: small feature map -> full HW per step,
    #    batch-tiled into one multi-image block.
    out = jax.block_until_ready(channel_attention(x, w1, w2))
    ref = _reference(x, w1, w2)
    assert out.shape == (B, C, 1, 1)
    assert jnp.allclose(out, ref, atol=1e-5, rtol=1e-5), "mismatch (auto path)"

    # 2) HW-tiled reduction path with a partial (masked) last tile:
    #    HW = 17*16 = 272, tile = 128 -> 3 hw steps, last one masked.
    H2, W2 = 17, 16
    x2 = jax.random.normal(kx2, (B, C, H2, W2), dtype=jnp.float32)
    out2 = jax.block_until_ready(channel_attention(x2, w1, w2, hw_tile=128))
    ref2 = _reference(x2, w1, w2)
    assert jnp.allclose(out2, ref2, atol=1e-5, rtol=1e-5), "mismatch (hw-tiled)"

    # 3) Batch-tiled + masked path together (Bb=2 accumulators and epilogue).
    out3 = jax.block_until_ready(
        channel_attention(x2, w1, w2, hw_tile=128, batch_tile=2))
    assert jnp.allclose(out3, ref2, atol=1e-5, rtol=1e-5), "mismatch (batch-tiled)"

    print("KERNEL_OK")
</pallas_src>

<mosaic_0001>
module attributes {stable_mosaic.version = 11 : i64} {
  func.func @_channel_attention_kernel(%arg0: i32, %arg1: i32, %arg2: memref<2x64x256xf32, #tpu.memory_space<vmem>>, %arg3: memref<64x4xf32, #tpu.memory_space<vmem>>, %arg4: memref<4x64xf32, #tpu.memory_space<vmem>>, %arg5: memref<2x64xf32, #tpu.memory_space<vmem>>, %arg6: memref<2x64xf32, #tpu.memory_space<vmem>>, %arg7: memref<2x64xf32, #tpu.memory_space<vmem>>) attributes {dimension_semantics = [#tpu.dimension_semantics<parallel>, #tpu.dimension_semantics<arbitrary>], iteration_bounds = array<i64: 1, 1>, scalar_prefetch = 0 : i64, scratch_operands = 2 : i64, tpu.core_type = #tpu.core_type<tc>, window_params = [{transform_indices = @transform_0, window_bounds = array<i64: 2, 64, 256>}, {pipeline_mode = #tpu.pipeline_mode<synchronous>, transform_indices = @transform_1, window_bounds = array<i64: 64, 4>}, {pipeline_mode = #tpu.pipeline_mode<synchronous>, transform_indices = @transform_2, window_bounds = array<i64: 4, 64>}, {transform_indices = @transform_3, window_bounds = array<i64: 2, 64>}]} {
    %c0_i32 = arith.constant 0 : i32
    %0 = arith.cmpi eq, %arg1, %c0_i32 : i32
    %1 = arith.extui %0 : i1 to i32
    %c0_i32_0 = arith.constant 0 : i32
    %2 = arith.cmpi ne, %1, %c0_i32_0 : i32
    scf.if %2 {
      %cst_14 = arith.constant 0xFF800000 : f32
      %15 = vector.broadcast %cst_14 : f32 to vector<2x64xf32>
      %c0_15 = arith.constant 0 : index
      %c0_16 = arith.constant 0 : index
      %16 = vector.load %arg6[%c0_15, %c0_16] : memref<2x64xf32, #tpu.memory_space<vmem>>, vector<2x64xf32>
      tpu.vector_store %arg6[%c0_15, %c0_16], %15 {strides = array<i32>} : memref<2x64xf32, #tpu.memory_space<vmem>>, vector<2x64xf32>,
      %cst_17 = arith.constant 0.000000e+00 : f32
      %17 = vector.broadcast %cst_17 : f32 to vector<2x64xf32>
      %c0_18 = arith.constant 0 : index
      %c0_19 = arith.constant 0 : index
      %18 = vector.load %arg7[%c0_18, %c0_19] : memref<2x64xf32, #tpu.memory_space<vmem>>, vector<2x64xf32>
      tpu.vector_store %arg7[%c0_18, %c0_19], %17 {strides = array<i32>} : memref<2x64xf32, #tpu.memory_space<vmem>>, vector<2x64xf32>,
    } else {
    }
    %c0 = arith.constant 0 : index
    %c0_1 = arith.constant 0 : index
    %c0_2 = arith.constant 0 : index
    %3 = vector.load %arg2[%c0, %c0_1, %c0_2] : memref<2x64x256xf32, #tpu.memory_space<vmem>>, vector<2x64x256xf32>
    %cst = arith.constant dense<0xFF800000> : vector<2x64xf32>
    %4 = vector.multi_reduction <maximumf>, %3, %cst [2] : vector<2x64x256xf32> to vector<2x64xf32>
    %cst_3 = arith.constant dense<0.000000e+00> : vector<2x64xf32>
    %5 = vector.multi_reduction <add>, %3, %cst_3 [2] : vector<2x64x256xf32> to vector<2x64xf32>
    %c0_4 = arith.constant 0 : index
    %c0_5 = arith.constant 0 : index
    %6 = vector.load %arg6[%c0_4, %c0_5] : memref<2x64xf32, #tpu.memory_space<vmem>>, vector<2x64xf32>
    %7 = arith.maximumf %6, %4 : vector<2x64xf32>
    %c0_6 = arith.constant 0 : index
    %c0_7 = arith.constant 0 : index
    %8 = vector.load %arg6[%c0_6, %c0_7] : memref<2x64xf32, #tpu.memory_space<vmem>>, vector<2x64xf32>
    tpu.vector_store %arg6[%c0_6, %c0_7], %7 {strides = array<i32>} : memref<2x64xf32, #tpu.memory_space<vmem>>, vector<2x64xf32>,
    %c0_8 = arith.constant 0 : index
    %c0_9 = arith.constant 0 : index
    %9 = vector.load %arg7[%c0_8, %c0_9] : memref<2x64xf32, #tpu.memory_space<vmem>>, vector<2x64xf32>
    %10 = arith.addf %9, %5 : vector<2x64xf32>
    %c0_10 = arith.constant 0 : index
    %c0_11 = arith.constant 0 : index
    %11 = vector.load %arg7[%c0_10, %c0_11] : memref<2x64xf32, #tpu.memory_space<vmem>>, vector<2x64xf32>
    tpu.vector_store %arg7[%c0_10, %c0_11], %10 {strides = array<i32>} : memref<2x64xf32, #tpu.memory_space<vmem>>, vector<2x64xf32>,
    %c0_i32_12 = arith.constant 0 : i32
    %12 = arith.cmpi eq, %arg1, %c0_i32_12 : i32
    %13 = arith.extui %12 : i1 to i32
    %c0_i32_13 = arith.constant 0 : i32
    %14 = arith.cmpi ne, %13, %c0_i32_13 : i32
    scf.if %14 {
      %c0_14 = arith.constant 0 : index
      %c0_15 = arith.constant 0 : index
      %15 = vector.load %arg6[%c0_14, %c0_15] : memref<2x64xf32, #tpu.memory_space<vmem>>, vector<2x64xf32>
      %c0_16 = arith.constant 0 : index
      %c0_17 = arith.constant 0 : index
      %16 = vector.load %arg7[%c0_16, %c0_17] : memref<2x64xf32, #tpu.memory_space<vmem>>, vector<2x64xf32>
      %cst_18 = arith.constant 3.906250e-03 : f32
      %17 = vector.broadcast %cst_18 : f32 to vector<2x64xf32>
      %18 = arith.mulf %16, %17 : vector<2x64xf32>
      %c0_19 = arith.constant 0 : index
      %c0_20 = arith.constant 0 : index
      %19 = vector.load %arg3[%c0_19, %c0_20] : memref<64x4xf32, #tpu.memory_space<vmem>>, vector<64x4xf32>
      %c0_21 = arith.constant 0 : index
      %c0_22 = arith.constant 0 : index
      %20 = vector.load %arg4[%c0_21, %c0_22] : memref<4x64xf32, #tpu.memory_space<vmem>>, vector<4x64xf32>
      %cst_23 = arith.constant dense<0.000000e+00> : vector<2x4xf32>
      %21 = tpu.matmul %15, %19, %cst_23 {dimension_numbers = #tpu.dot_dimension_numbers<[1], [0], [0], [1], [0, 0, 1, 1], [], []>} : vector<2x64xf32>, vector<64x4xf32>, vector<2x4xf32> -> vector<2x4xf32>
      %cst_24 = arith.constant 0.000000e+00 : f32
      %22 = vector.broadcast %cst_24 : f32 to vector<2x4xf32>
      %23 = arith.maximumf %21, %22 : vector<2x4xf32>
      %cst_25 = arith.constant dense<0.000000e+00> : vector<2x64xf32>
      %24 = tpu.matmul %23, %20, %cst_25 {dimension_numbers = #tpu.dot_dimension_numbers<[1], [0], [0], [1], [0, 0, 1, 1], [], []>} : vector<2x4xf32>, vector<4x64xf32>, vector<2x64xf32> -> vector<2x64xf32>
      %cst_26 = arith.constant dense<0.000000e+00> : vector<2x4xf32>
      %25 = tpu.matmul %18, %19, %cst_26 {dimension_numbers = #tpu.dot_dimension_numbers<[1], [0], [0], [1], [0, 0, 1, 1], [], []>} : vector<2x64xf32>, vector<64x4xf32>, vector<2x4xf32> -> vector<2x4xf32>
      %cst_27 = arith.constant 0.000000e+00 : f32
      %26 = vector.broadcast %cst_27 : f32 to vector<2x4xf32>
      %27 = arith.maximumf %25, %26 : vector<2x4xf32>
      %cst_28 = arith.constant dense<0.000000e+00> : vector<2x64xf32>
      %28 = tpu.matmul %27, %20, %cst_28 {dimension_numbers = #tpu.dot_dimension_numbers<[1], [0], [0], [1], [0, 0, 1, 1], [], []>} : vector<2x4xf32>, vector<4x64xf32>, vector<2x64xf32> -> vector<2x64xf32>
      %29 = arith.addf %24, %28 : vector<2x64xf32>
      %30 = arith.negf %29 : vector<2x64xf32>
      %31 = math.exp %30 : vector<2x64xf32>
      %cst_29 = arith.constant 1.000000e+00 : f32
      %32 = vector.broadcast %cst_29 : f32 to vector<2x64xf32>
      %33 = arith.addf %32, %31 : vector<2x64xf32>
      %34 = arith.divf %32, %33 : vector<2x64xf32>
      %c0_30 = arith.constant 0 : index
      %c0_31 = arith.constant 0 : index
      %35 = vector.load %arg5[%c0_30, %c0_31] : memref<2x64xf32, #tpu.memory_space<vmem>>, vector<2x64xf32>
      tpu.vector_store %arg5[%c0_30, %c0_31], %34 {strides = array<i32>} : memref<2x64xf32, #tpu.memory_space<vmem>>, vector<2x64xf32>,
    } else {
    }
    return
  }
  func.func @transform_0(%arg0: i32, %arg1: i32) -> (i32, i32, i32) {
    %c0_i32 = arith.constant 0 : i32
    %c0_i32_0 = arith.constant 0 : i32
    return %arg0, %c0_i32, %arg1 : i32, i32, i32
  }
  func.func @transform_1(%arg0: i32, %arg1: i32) -> (i32, i32) {
    %c0_i32 = arith.constant 0 : i32
    %c0_i32_0 = arith.constant 0 : i32
    %c0_i32_1 = arith.constant 0 : i32
    return %c0_i32, %c0_i32_0 : i32, i32
  }
  func.func @transform_2(%arg0: i32, %arg1: i32) -> (i32, i32) {
    %c0_i32 = arith.constant 0 : i32
    %c0_i32_0 = arith.constant 0 : i32
    %c0_i32_1 = arith.constant 0 : i32
    return %c0_i32, %c0_i32_0 : i32, i32
  }
  func.func @transform_3(%arg0: i32, %arg1: i32) -> (i32, i32) {
    %c0_i32 = arith.constant 0 : i32
    %c0_i32_0 = arith.constant 0 : i32
    return %arg0, %c0_i32 : i32, i32
  }
}

</mosaic_0001>

<bundles_post_ra>
// kernel: tpu_custom_call.1
= control target key start
LH: loop header
LB: loop body
LE: loop exit
PB: predicated region body
PF: predicated region fallthrough
CT: control target
= control target key end

     0   :  { %8 = vsyncpa [#allocation5], 0  ;;  %s731_s0 = inlined_call_operand.hbm [shape: f32[2,64,256], index: 0, kind: input, shape index: {}]   ;;  %s732_s1 = inlined_call_operand.vmem [shape: f32[64,4], index: 1, kind: input, shape index: {}]   ;;  %s733_s2 = inlined_call_operand.vmem [shape: f32[4,64], index: 2, kind: input, shape index: {}]   ;;  %s734_s3 = inlined_call_operand.hbm [shape: f32[2,64], index: 3, kind: output, shape index: {}]  }
   0x1   :  { %9 = vsyncpa [#allocation6], 0  ;;  %s14_s14 = sshll.u32 %s731_s0, 4  ;;  %s507_s15 = smov [#allocation4]   ;;  %s15_s14 = int_to_ptr.hbm [resolvable:$true] %s14_s14 }
   0x2   :  { %s16_s16 = sshll.u32 %s507_s15, 4  ;;  %s508_s17 = smov 256   ;;  %s17_s16 = int_to_ptr.vmem [resolvable:$true] %s16_s16 }
   0x3   :  { %s509_s18 = smov 16  }
   0x4   :  { %22 = dma.hbm_to_vmem [thread:$0]  %s15_s14, 4096, %s17_s16, [#allocation5], %s508_s17, %s508_s17, %s509_s18  }
   0x5   :  { %503 = dma.done.wait [#allocation5], 4096  }
   0x6   :  { %504 = vsyncadd [#allocation5], 4294963200  ;;  %v54_v0 = vld [vmem:[#allocation4 + $0x80] sm:$0xff]  ;;  %v55_v1 = vld [vmem:[#allocation4 + $0x88] sm:$0xff]  ;;  %vm35_vm0 = vcmask 517120   ;;  %vm188_vm1 = vcmask 130112  }
   0x7   :  { %v42_v2 = vld [vmem:[#allocation4 + $0x20] sm:$0xff]  ;;  %v142_v3 = vadd.f32 %v55_v1, %v54_v0  ;;  %v43_v4 = vld [vmem:[#allocation4 + $0x28] sm:$0xff]  ;;  %v56_v9 = vld [vmem:[#allocation4 + $0x90] sm:$0xff]  ;;  %v94_v19 = vmax.f32 %v54_v0, %v55_v1  ;;  %vm192_vm2 = vcmask 195712   ;;  %vm196_vm3 = vcmask 261312   ;;  %s428_s11 = sshll.u32 %s734_s3, 4  ;;  %s429_s11 = int_to_ptr.hbm [resolvable:$true] %s428_s11 }
   0x8   :  { %v38_v5 = vld [vmem:[#allocation4] sm:$0xff]  ;;  %v39_v6 = vld [vmem:[#allocation4 + $0x8] sm:$0xff]  ;;  %v124_v7 = vadd.f32 %v43_v4, %v42_v2  ;;  %v57_v10 = vld [vmem:[#allocation4 + $0x98] sm:$0xff]  ;;  %v76_v32 = vmax.f32 %v42_v2, %v43_v4  ;;  %vm200_vm4 = vcmask 326912   ;;  %vm204_vm5 = vcmask 392512  }
   0x9   :  { %v118_v8 = vadd.f32 %v39_v6, %v38_v5  ;;  %143 = vadd.xlane.f32.xlu1 %v142_v3  ;;  %v58_v11 = vld [vmem:[#allocation4 + $0xa0] sm:$0xff]  ;;  %v59_v12 = vld [vmem:[#allocation4 + $0xa8] sm:$0xff]  ;;  %v40_v13 = vld [vmem:[#allocation4 + $0x10] sm:$0xff]  ;;  %v145_v15 = vadd.f32 %v57_v10, %v56_v9  ;;  %v70_v20 = vmax.f32 %v38_v5, %v39_v6  ;;  %v97_v27 = vmax.f32 %v56_v9, %v57_v10 }
   0xa   :  { %125 = vadd.xlane.f32.xlu2 %v124_v7  ;;  %v41_v14 = vld [vmem:[#allocation4 + $0x18] sm:$0xff]  ;;  %v148_v16 = vadd.f32 %v59_v12, %v58_v11  ;;  %v44_v21 = vld [vmem:[#allocation4 + $0x30] sm:$0xff]  ;;  %v46_v28 = vld [vmem:[#allocation4 + $0x40] sm:$0xff]  ;;  %v100_v30 = vmax.f32 %v58_v11, %v59_v12  ;;  %vm208_vm6 = vcmask 458112   ;;  %vm212_vm7 = vcmask 523712  }
   0xb   :  { %119 = vadd.xlane.f32.xlu0 %v118_v8  ;;  %v121_v17 = vadd.f32 %v41_v14, %v40_v13  ;;  %v73_v18 = vmax.f32 %v40_v13, %v41_v14  ;;  %v45_v22 = vld [vmem:[#allocation4 + $0x38] sm:$0xff]  ;;  %v60_v23 = vld [vmem:[#allocation4 + $0xb0] sm:$0xff]  ;;  %v47_v29 = vld [vmem:[#allocation4 + $0x48] sm:$0xff]  ;;  %vm229_vm8 = vcmask 1041409   ;;  %vm301_vm9 = vcmask 523264  }
   0xc   :  { %v61_v24 = vld [vmem:[#allocation4 + $0xb8] sm:$0xff]  ;;  %v127_v25 = vadd.f32 %v45_v22, %v44_v21  ;;  %v130_v31 = vadd.f32 %v47_v29, %v46_v28  ;;  %v62_v33 = vld [vmem:[#allocation4 + $0xc0] sm:$0xff]  ;;  %v63_v34 = vld [vmem:[#allocation4 + $0xc8] sm:$0xff]  ;;  %v79_v35 = vmax.f32 %v44_v21, %v45_v22  ;;  %v82_v43 = vmax.f32 %v46_v28, %v47_v29 }
   0xd   :  { %v151_v26 = vadd.f32 %v61_v24, %v60_v23  ;;  %v103_v36 = vmax.f32 %v60_v23, %v61_v24  ;;  %v154_v37 = vadd.f32 %v63_v34, %v62_v33  ;;  %v64_v38 = vld [vmem:[#allocation4 + $0xd0] sm:$0xff]  ;;  %v65_v39 = vld [vmem:[#allocation4 + $0xd8] sm:$0xff]  ;;  %v50_v45 = vld [vmem:[#allocation4 + $0x60] sm:$0xff]  ;;  %v106_v51 = vmax.f32 %v62_v33, %v63_v34 }
   0xe   :  { %v48_v40 = vld [vmem:[#allocation4 + $0x50] sm:$0xff]  ;;  %v49_v41 = vld [vmem:[#allocation4 + $0x58] sm:$0xff]  ;;  %v157_v42 = vadd.f32 %v65_v39, %v64_v38  ;;  %v51_v46 = vld [vmem:[#allocation4 + $0x68] sm:$0xff]  ;;  %v109_v54 = vmax.f32 %v64_v38, %v65_v39  ;;  %v511_v22 = vmov -inf   ;;  %v183_v28 = vlaneseq }
   0xf   :  { %v133_v44 = vadd.f32 %v49_v41, %v48_v40  ;;  %v66_v47 = vld [vmem:[#allocation4 + $0xe0] sm:$0xff]  ;;  %v67_v48 = vld [vmem:[#allocation4 + $0xe8] sm:$0xff]  ;;  %v136_v49 = vadd.f32 %v51_v46, %v50_v45  ;;  %v52_v52 = vld [vmem:[#allocation4 + $0x70] sm:$0xff]  ;;  %v85_v56 = vmax.f32 %v48_v40, %v49_v41  ;;  %v88_v59 = vmax.f32 %v50_v45, %v51_v46  ;;  %36 = vst.msk [vmem:[#allocation2] sm:$0x3] %vm35_vm0, %v511_v22 }
  0x10   :  { %v160_v50 = vadd.f32 %v67_v48, %v66_v47  ;;  %v53_v53 = vld [vmem:[#allocation4 + $0x78] sm:$0xff]  ;;  %v68_v57 = vld [vmem:[#allocation4 + $0xf0] sm:$0xff]  ;;  %v112_v60 = vmax.f32 %v66_v47, %v67_v48  ;;  %v297_v21 = vld [vmem:[%s732_s1 + $0x28] sm:$0xff]  ;;  %vm354_vm10 = vcmask 1043456   ;;  %vm350_vm11 = vcmask 31744  }
  0x11   :  { %146 = vadd.xlane.f32.xlu1 %v145_v15  ;;  %v139_v55 = vadd.f32 %v53_v53, %v52_v52  ;;  %v69_v58 = vld [vmem:[#allocation4 + $0xf8] sm:$0xff]  ;;  %v91_v63 = vmax.f32 %v52_v52, %v53_v53  ;;  %v510_v15 = vmov 0.0   ;;  %v294_v29 = vld [vmem:[%s732_s1 + $0x10] sm:$0xff] }
  0x12   :  { %149 = vadd.xlane.f32.xlu2 %v148_v16  ;;  %v163_v61 = vadd.f32 %v69_v58, %v68_v57  ;;  %v115_v62 = vmax.f32 %v68_v57, %v69_v58  ;;  %37 = vst.msk [vmem:[#allocation3] sm:$0x3] %vm35_vm0, %v510_v15  ;;  %v296_v24 = vld [vmem:[%s732_s1 + $0x20] sm:$0xff] }
  0x13   :  { %122 = vadd.xlane.f32.xlu0 %v121_v17  ;;  %v292_v33 = vld [vmem:[%s732_s1] sm:$0xff] }
  0x19   :  { %74 = vmax.xlane.f32.xlu1 %v73_v18 }
  0x1a   :  { %95 = vmax.xlane.f32.xlu2 %v94_v19  ;;  %v299_v19 = vld [vmem:[%s732_s1 + $0x38] sm:$0xff] }
  0x1b   :  { %71 = vmax.xlane.f32.xlu0 %v70_v20  ;;  %337 = vmatpush.msra.mxu1 %v299_v19  ;;  %v298_v20 = vld [vmem:[%s732_s1 + $0x30] sm:$0xff] }
  0x1c   :  { %313 = vmatpush.msra.mxu0 %v299_v19 }
  0x1d   :  { %338 = vmatpush.msra.mxu1 %v298_v20 }
  0x1e   :  { %314 = vmatpush.msra.mxu0 %v298_v20 }
  0x1f   :  { %339 = vmatpush.msra.mxu1 %v297_v21 }
  0x20   :  { %315 = vmatpush.msra.mxu0 %v297_v21 }
  0x21   :  { %128 = vadd.xlane.f32.xlu1 %v127_v25  ;;  %340 = vmatpush.msra.mxu1 %v296_v24 }
  0x22   :  { %152 = vadd.xlane.f32.xlu2 %v151_v26  ;;  %316 = vmatpush.msra.mxu0 %v296_v24  ;;  %v235_v24 = vld [vmem:[#allocation3] sm:$0x3] }
  0x23   :  { %98 = vmax.xlane.f32.xlu0 %v97_v27  ;;  %v295_v27 = vld [vmem:[%s732_s1 + $0x18] sm:$0xff] }
  0x24   :  { %341 = vmatpush.msra.mxu1 %v295_v27  ;;  %317 = vmatpush.msra.mxu0 %v295_v27 }
  0x26   :  { %342 = vmatpush.msra.mxu1 %v294_v29  ;;  %318 = vmatpush.msra.mxu0 %v294_v29 }
  0x29   :  { %101 = vmax.xlane.f32.xlu1 %v100_v30  ;;  %v293_v30 = vld [vmem:[%s732_s1 + $0x8] sm:$0xff] }
  0x2a   :  { %131 = vadd.xlane.f32.xlu2 %v130_v31  ;;  %343 = vmatpush.msra.mxu1 %v293_v30  ;;  %v601_v31 = vand.u32 127, %v183_v28 }
  0x2b   :  { %77 = vmax.xlane.f32.xlu0 %v76_v32  ;;  %319 = vmatpush.msra.mxu0 %v293_v30 }
  0x2c   :  { %344 = vmatpush.msra.mxu1 %v292_v33  ;;  %v618_v39 = vadd.s32 4294967280, %v601_v31  ;;  %v632_v45 = vadd.s32 4294967264, %v601_v31  ;;  %v655_v57 = vadd.s32 4294967240, %v601_v31 }
  0x2d   :  { %320 = vmatpush.msra.mxu0 %v292_v33 }
  0x31   :  { %80 = vmax.xlane.f32.xlu1 %v79_v35 }
  0x32   :  { %104 = vmax.xlane.f32.xlu2 %v103_v36  ;;  %v611_v36 = vadd.s32 4294967288, %v601_v31 }
  0x33   :  { %155 = vadd.xlane.f32.xlu0 %v154_v37 }
  0x39   :  { %158 = vadd.xlane.f32.xlu1 %v157_v42  ;;  %v625_v42 = vadd.s32 4294967272, %v601_v31 }
  0x3a   :  { %83 = vmax.xlane.f32.xlu2 %v82_v43 }
  0x3b   :  { %134 = vadd.xlane.f32.xlu0 %v133_v44 }
  0x41   :  { %137 = vadd.xlane.f32.xlu1 %v136_v49 }
  0x42   :  { %161 = vadd.xlane.f32.xlu2 %v160_v50  ;;  %v639_v50 = vadd.s32 4294967256, %v601_v31 }
  0x43   :  { %107 = vmax.xlane.f32.xlu0 %v106_v51 }
  0x49   :  { %110 = vmax.xlane.f32.xlu1 %v109_v54  ;;  %v648_v54 = vadd.s32 4294967248, %v601_v31 }
  0x4a   :  { %140 = vadd.xlane.f32.xlu2 %v139_v55 }
  0x4b   :  { %86 = vmax.xlane.f32.xlu0 %v85_v56 }
  0x51   :  { %89 = vmax.xlane.f32.xlu1 %v88_v59 }
  0x52   :  { %113 = vmax.xlane.f32.xlu2 %v112_v60 }
  0x53   :  { %164 = vadd.xlane.f32.xlu0 %v163_v61 }
  0x59   :  { %116 = vmax.xlane.f32.xlu1 %v115_v62 }
  0x5b   :  { %92 = vmax.xlane.f32.xlu0 %v91_v63 }
  0x7c   :  { %v536_v0 = vpop.xlane.xlu1 %143 }
  0x7d   :  { %v538_v1 = vpop.xlane.xlu2 %125  ;;  %v267_v40 = vperm.slane %v536_v0, %v601_v31 }
  0x7e   :  { %v540_v2 = vpop.xlane.xlu0 %119  ;;  %v255_v51 = vperm.slane %v538_v1, %v618_v39 }
  0x7f   :  { %v252_v41 = vperm.slane %v540_v2, %v601_v31 }
  0x84   :  { %v542_v3 = vpop.xlane.xlu1 %146 }
  0x85   :  { %v544_v4 = vpop.xlane.xlu2 %149  ;;  %v268_v37 = vperm.slane %v542_v3, %v611_v36 }
  0x86   :  { %v546_v5 = vpop.xlane.xlu0 %122  ;;  %v270_v44 = vperm.slane %v544_v4, %v618_v39 }
  0x87   :  { %v253_v38 = vperm.slane %v546_v5, %v611_v36  ;;  %v269_v48 = vsel %vm188_vm1, %v268_v37, %v267_v40 }
  0x88   :  { %v271_v58 = vsel %vm192_vm2, %v270_v44, %v269_v48 }
  0x89   :  { %v254_v49 = vsel %vm188_vm1, %v253_v38, %v252_v41 }
  0x8a   :  { %v256_v59 = vsel %vm192_vm2, %v255_v51, %v254_v49  ;;  %v166_v49 = vld [vmem:[#allocation2] sm:$0x3] }
  0x8c   :  { %v548_v6 = vpop.xlane.xlu1 %74 }
  0x8d   :  { %v550_v7 = vpop.xlane.xlu2 %95  ;;  %v187_v52 = vperm.slane %v548_v6, %v611_v36 }
  0x8e   :  { %v552_v8 = vpop.xlane.xlu0 %71  ;;  %v214_v62 = vperm.slane %v550_v7, %v601_v31 }
  0x8f   :  { %v185_v53 = vperm.slane %v552_v8, %v601_v31 }
  0x91   :  { %v189_v1 = vsel %vm188_vm1, %v187_v52, %v185_v53 }
  0x94   :  { %v554_v9 = vpop.xlane.xlu1 %128 }
  0x95   :  { %v556_v10 = vpop.xlane.xlu2 %152  ;;  %v257_v56 = vperm.slane %v554_v9, %v625_v42 }
  0x96   :  { %v558_v11 = vpop.xlane.xlu0 %98  ;;  %v272_v55 = vperm.slane %v556_v10, %v625_v42 }
  0x97   :  { %v258_v5 = vsel %vm196_vm3, %v257_v56, %v256_v59  ;;  %v215_v6 = vperm.slane %v558_v11, %v611_v36  ;;  %v300_v56 = vld [vmem:[%s733_s2] sm:$0xf]  ;;  %s512_s2 = smov [#allocation7]  }
  0x98   :  { %v273_v4 = vsel %vm196_vm3, %v272_v55, %v271_v58  ;;  %440 = vmatpush.msk.msra.mxu2 %vm354_vm10, %v300_v56  ;;  %442 = vmatpush.msk.msra.mxu3 %vm354_vm10, %v300_v56  ;;  %s426_s8 = sshll.u32 %s512_s2, 4  ;;  %s427_s8 = int_to_ptr.vmem [resolvable:$true] %s426_s8 }
  0x9c   :  { %v560_v12 = vpop.xlane.xlu1 %101 }
  0x9d   :  { %v562_v13 = vpop.xlane.xlu2 %131  ;;  %v217_v10 = vperm.slane %v560_v12, %v618_v39 }
  0x9e   :  { %v564_v14 = vpop.xlane.xlu0 %77  ;;  %v259_v60 = vperm.slane %v562_v13, %v632_v45 }
  0x9f   :  { %v191_v11 = vperm.slane %v564_v14, %v618_v39  ;;  %v216_v14 = vsel %vm188_vm1, %v215_v6, %v214_v62 }
  0xa0   :  { %v260_v9 = vsel %vm200_vm4, %v259_v60, %v258_v5 }
  0xa4   :  { %v567_v16 = vpop.xlane.xlu1 %80 }
  0xa5   :  { %v569_v17 = vpop.xlane.xlu2 %104 }
  0xa6   :  { %v571_v18 = vpop.xlane.xlu0 %155  ;;  %v219_v21 = vperm.slane %v569_v17, %v625_v42 }
  0xa7   :  { %v274_v61 = vperm.slane %v571_v18, %v632_v45 }
  0xa9   :  { %v275_v13 = vsel %vm200_vm4, %v274_v61, %v273_v4 }
  0xac   :  { %v583_v23 = vpop.xlane.xlu1 %158 }
  0xad   :  { %v588_v25 = vpop.xlane.xlu2 %83  ;;  %v276_v63 = vperm.slane %v583_v23, %v639_v50 }
  0xae   :  { %v590_v26 = vpop.xlane.xlu0 %134  ;;  %v199_v17 = vperm.slane %v588_v25, %v632_v45 }
  0xaf   :  { %v261_v0 = vperm.slane %v590_v26, %v639_v50  ;;  %v277_v18 = vsel %vm204_vm5, %v276_v63, %v275_v13  ;;  %v195_v26 = vperm.slane %v567_v16, %v625_v42 }
  0xb1   :  { %v262_v19 = vsel %vm204_vm5, %v261_v0, %v260_v9 }
  0xb4   :  { %v603_v32 = vpop.xlane.xlu1 %137 }
  0xb5   :  { %v162_v34 = vpop.xlane.xlu2 %161  ;;  %v263_v3 = vperm.slane %v603_v32, %v648_v54  ;;  %v218_v32 = vsel %vm192_vm2, %v217_v10, %v216_v14 }
  0xb6   :  { %v608_v35 = vpop.xlane.xlu0 %107  ;;  %v278_v2 = vperm.slane %v162_v34, %v648_v54  ;;  %v220_v36 = vsel %vm196_vm3, %v219_v21, %v218_v32 }
  0xb7   :  { %v264_v12 = vsel %vm208_vm6, %v263_v3, %v262_v19  ;;  %v221_v27 = vperm.slane %v608_v35, %v632_v45  ;;  %v193_v35 = vsel %vm192_vm2, %v191_v11, %v189_v1 }
  0xb8   :  { %v279_v22 = vsel %vm208_vm6, %v278_v2, %v277_v18  ;;  %v197_v25 = vsel %vm196_vm3, %v195_v26, %v193_v35 }
  0xb9   :  { %v222_v38 = vsel %vm200_vm4, %v221_v27, %v220_v36  ;;  %v201_v40 = vsel %vm200_vm4, %v199_v17, %v197_v25 }
  0xbc   :  { %v627_v43 = vpop.xlane.xlu1 %110 }
  0xbd   :  { %v141_v46 = vpop.xlane.xlu2 %140  ;;  %v223_v30 = vperm.slane %v627_v43, %v639_v50 }
  0xbe   :  { %v634_v47 = vpop.xlane.xlu0 %86  ;;  %v265_v7 = vperm.slane %v141_v46, %v655_v57 }
  0xbf   :  { %v203_v16 = vperm.slane %v634_v47, %v639_v50  ;;  %v224_v41 = vsel %vm204_vm5, %v223_v30, %v222_v38 }
  0xc0   :  { %v266_v28 = vsel %vm212_vm7, %v265_v7, %v264_v12 }
  0xc1   :  { %v205_v44 = vsel %vm204_vm5, %v203_v16, %v201_v40 }
  0xc4   :  { %v90_v8 = vpop.xlane.xlu1 %89 }
  0xc5   :  { %v114_v23 = vpop.xlane.xlu2 %113  ;;  %v207_v37 = vperm.slane %v90_v8, %v648_v54 }
  0xc6   :  { %v165_v15 = vpop.xlane.xlu0 %164  ;;  %v225_v33 = vperm.slane %v114_v23, %v648_v54 }
  0xc7   :  { %v280_v20 = vperm.slane %v165_v15, %v655_v57  ;;  %v209_v47 = vsel %vm208_vm6, %v207_v37, %v205_v44 }
  0xc8   :  { %v226_v45 = vsel %vm208_vm6, %v225_v33, %v224_v41 }
  0xc9   :  { %v281_v29 = vsel %vm212_vm7, %v280_v20, %v279_v22 }
  0xca   :  { %v282_v31 = vsel %vm229_vm8, %v281_v29, %v266_v28 }
  0xcb   :  { %v284_v34 = vadd.f32 %v282_v31, %v235_v24 }
  0xcc   :  { %v117_v39 = vpop.xlane.xlu1 %116 }
  0xcd   :  { %285 = vst.msk [vmem:[#allocation3] sm:$0x3] %vm35_vm0, %v284_v34  ;;  %v227_v42 = vperm.slane %v117_v39, %v655_v57 }
  0xce   :  { %v93_v43 = vpop.xlane.xlu0 %92 }
  0xcf   :  { %v211_v46 = vperm.slane %v93_v43, %v655_v57  ;;  %v228_v48 = vsel %vm212_vm7, %v227_v42, %v226_v45 }
  0xd1   :  { %v213_v50 = vsel %vm212_vm7, %v211_v46, %v209_v47 }
  0xd2   :  { %v230_v51 = vsel %vm229_vm8, %v228_v48, %v213_v50 }
  0xd3   :  { %v232_v52 = vmax.f32 %v166_v49, %v230_v51 }
  0xd4   :  { %v290_v53 = vld [vmem:[#allocation3] sm:$0x3] }
  0xd5   :  { %234 = vst.msk [vmem:[#allocation2] sm:$0x3] %vm35_vm0, %v232_v52  ;;  %v291_v54 = vmul.f32 0.00390625, %v290_v53 }
  0xd7   :  { %439 = vmatmul.msk.f32.vlgmr.msra.gmra.mxu1 %vm301_vm9, %v291_v54 }
  0xdc   :  { %v289_v55 = vld [vmem:[#allocation2] sm:$0x3] }
  0xdd   :  { %438 = vmatmul.msk.f32.vlgmr.msra.gmra.mxu0 %vm301_vm9, %v289_v55 }
 0x154   :  { %v346_v57 = vpop.f32.mrf.mxu1 }
 0x155   :  { %v349_v58 = vmax.f32 %v346_v57, 0.0 }
 0x157   :  { %441 = vmatmul.msk.f32.vlgmr.msra.gmra.mxu2 %vm350_vm11, %v349_v58 }
 0x15a   :  { %v322_v59 = vpop.f32.mrf.mxu0 }
 0x15b   :  { %v325_v60 = vmax.f32 %v322_v59, 0.0 }
 0x15d   :  { %443 = vmatmul.msk.f32.vlgmr.msra.gmra.mxu3 %vm350_vm11, %v325_v60 }
 0x1da   :  { %v375_v61 = vpop.f32.mrf.mxu2 }
 0x1e0   :  { %v398_v62 = vpop.f32.mrf.mxu3 }
 0x1e1   :  { %v399_v63 = vadd.f32 %v398_v62, %v375_v61 }
 0x1e3   :  { %v444_v0 = vmul.f32 -1.442695, %v399_v63 }
 0x1e5   :  { %451 = vpow2.f32 %v444_v0 }
 0x1eb   :  { %v452_v1 = vpop.eup %451 }
 0x1ec   :  { %v404_v2 = vadd.f32 1.0, %v452_v1 }
 0x1ee   :  { %453 = vrcp.f32 %v404_v2  ;;  %v416_v6 = vand.u32 2147483648, %v404_v2  ;;  %v414_v8 = vand.u32 2147483647, %v404_v2  ;;  %vm410_vm13 = vweird.f32 %v404_v2 }
 0x1f0   :  { %v417_v10 = vor.u32 1.1754944e-38, %v416_v6  ;;  %vm415_vm15 = vcmp.eq.f32.partialorder %v414_v8, 8.507059e+37 }
 0x1f4   :  { %v454_v3 = vpop.eup %453 }
 0x1f5   :  { %v406_v4 = vmul.f32 %v454_v3, %v404_v2  ;;  %vm411_vm12 = vweird.f32 %v454_v3 }
 0x1f6   :  { %vm412_vm14 = vmor %vm410_vm13, %vm411_vm12 }
 0x1f7   :  { %v407_v5 = vsub.f32 1.0, %v406_v4 }
 0x1f9   :  { %v408_v7 = vmul.f32 %v454_v3, %v407_v5 }
 0x1fb   :  { %v409_v9 = vadd.f32 %v454_v3, %v408_v7 }
 0x1fd   :  { %v413_v13 = vsel %vm412_vm14, %v454_v3, %v409_v9 }
 0x1fe   :  { %v418_v15 = vsel %vm415_vm15, %v417_v10, %v413_v13 }
 0x1ff   :  { %420 = vst.msk [vmem:[#allocation7] sm:$0x3] %vm35_vm0, %v418_v15 }
 0x200   :  { %431 = dma.vmem_to_hbm [thread:$0]  %s427_s8, 32, %s429_s11, [#allocation6]  }
 0x201   :  { %505 = dma.done.wait [#allocation6], 32  }
 0x202   :  { %506 = vsyncadd [#allocation6], 4294967264 }
 0x203   :  { %436 = vsyncpa [#allocation5], 1 }
 0x204   :  { %437 = vsyncpa [#allocation6], 1 }

</bundles_post_ra>
